<compile_context>
chip_gen: v5e
topology: v5e:2x2
jax: 0.10.0
libtpu: 0.0.40
codegen_flags: <defaults>
</compile_context>

<pallas_src>
import jax
import jax.numpy as jnp
from jax import lax
from jax.experimental import pallas as pl
from jax.experimental.pallas import tpu as pltpu


def logreg_kernel(x_ref, w_ref, b_ref, o_ref):
    # x_ref: (tb, F) VMEM (streamed)   w_ref: (1, F) VMEM (resident)
    # b_ref: (1,)    SMEM scalar       o_ref: (1, tb) VMEM (lane-dense)
    # (1, F) contracted with (tb, F) over F -> (1, tb); MXU accumulates in f32.
    z = lax.dot_general(
        w_ref[...], x_ref[...],
        dimension_numbers=(((1,), (1,)), ((), ())),
        preferred_element_type=jnp.float32)
    z = z + b_ref[0]
    # Exact sigmoid: exp rides the EUP, the divide costs nothing in a kernel
    # that is DMA-bound.
    o_ref[...] = (1.0 / (1.0 + jnp.exp(-z))).astype(o_ref.dtype)


def _pick_batch_tile(B, F, x_itemsize, out_itemsize, *, n_x_buffers,
                     vmem_budget_bytes):
    """Largest lane-aligned batch tile whose live VMEM buffers fit the budget.

    Accounts for lane padding: a (tb, F) block occupies
    tb * ceil(F/128)*128 * itemsize bytes of VMEM (not tb*F*itemsize), and the
    (1, tb) output block is sublane-padded to 8 rows and double-buffered.
    Weight / bias buffers are negligible.
    """
    lane = 128
    padded_f = pl.cdiv(F, lane) * lane
    per_row = n_x_buffers * padded_f * x_itemsize + 2 * 8 * out_itemsize
    rows = vmem_budget_bytes // per_row
    rows = (rows // lane) * lane          # lane-aligned out block, 8-aligned x rows
    return max(rows, lane)


def logistic_regression(x, weight, bias, *, batch_tile=None, stream_dtype=None,
                        vmem_budget_bytes=36 << 20, vmem_limit_bytes=48 << 20):
    """sigmoid(x @ weight.T + bias).

    x: (B, F); weight: (1, F) (PyTorch nn.Linear layout); bias: (1,).
    Defaults are safe on v7x (64 MiB physical VMEM); on v5e/v6e (128 MiB) the
    budget/limit can be raised (e.g. 80 MiB / 96 MiB) to cut grid-step count.
    Pass stream_dtype=jnp.bfloat16 to halve HBM traffic for x and W.
    """
    B, F = x.shape
    out_dtype = x.dtype
    if stream_dtype is not None:
        x = x.astype(stream_dtype)                 # bf16 streaming: ~2x fewer bytes
    w = weight.reshape(1, F).astype(x.dtype)
    b = bias.reshape(1).astype(jnp.float32)        # scalar -> SMEM

    n_x_buffers = 3                                # triple-buffer the streamed x
    if batch_tile is None:
        batch_tile = _pick_batch_tile(
            B, F, x.dtype.itemsize, out_dtype.itemsize,
            n_x_buffers=n_x_buffers, vmem_budget_bytes=vmem_budget_bytes)
    tb = B if B <= batch_tile else batch_tile      # full array or 128-multiple
    grid = (pl.cdiv(B, tb),)

    # Ask for a 3rd x buffer only when there is more than one grid step to
    # overlap; degrade gracefully if this JAX build lacks `pipeline_mode`.
    if grid[0] > 1:
        try:
            x_spec = pl.BlockSpec((tb, F), lambda i: (i, 0),
                                  pipeline_mode=pl.Buffered(n_x_buffers))
        except TypeError:
            x_spec = pl.BlockSpec((tb, F), lambda i: (i, 0))
    else:
        x_spec = pl.BlockSpec((tb, F), lambda i: (i, 0))

    cost = pl.CostEstimate(
        flops=2 * B * F,
        bytes_accessed=x.dtype.itemsize * (B * F + F)
        + out_dtype.itemsize * B + 4,
        transcendentals=2 * B,                     # exp + reciprocal per row
    )

    out = pl.pallas_call(
        logreg_kernel,
        out_shape=jax.ShapeDtypeStruct((1, B), out_dtype),      # lane-dense row
        grid_spec=pltpu.PrefetchScalarGridSpec(
            num_scalar_prefetch=0,
            grid=grid,
            in_specs=[
                x_spec,                                          # streamed x tiles
                pl.BlockSpec((1, F), lambda i: (0, 0)),          # resident weights
                pl.BlockSpec(memory_space=pltpu.MemorySpace.SMEM),  # scalar bias
            ],
            out_specs=pl.BlockSpec((1, tb), lambda i: (0, i)),
        ),
        compiler_params=pltpu.CompilerParams(
            dimension_semantics=("parallel",),     # shard batch tiles across TCs
            vmem_limit_bytes=vmem_limit_bytes,
        ),
        cost_estimate=cost,
    )(x, w, b)
    return out.reshape(B, 1)

# TODO(synk): for F so wide that even a 128-row lane-padded tile overflows the
# VMEM budget, add an "arbitrary" reduction grid axis over F with a (1, tb)
# f32 VMEM accumulator.


if __name__ == "__main__":
    key = jax.random.PRNGKey(0)
    kx, kw, kb, kx2 = jax.random.split(key, 4)

    # Small shapes consistent with the module: batch=8, n_features=32.
    batch, n_features = 8, 32
    x = jax.random.normal(kx, (batch, n_features), dtype=jnp.float32)

    # nn.Linear-style init: uniform(-1/sqrt(F), 1/sqrt(F)).
    bound = 1.0 / jnp.sqrt(jnp.float32(n_features))
    weight = jax.random.uniform(kw, (1, n_features), jnp.float32, -bound, bound)
    bias = jax.random.uniform(kb, (1,), jnp.float32, -bound, bound)

    out = jax.block_until_ready(logistic_regression(x, weight, bias))
    ref = jax.nn.sigmoid(x @ weight.T + bias)
    assert out.shape == (batch, 1)
    # Sigmoid is exact now; tolerance only covers f32-via-bf16 MXU pass
    # differences between the kernel dot and the XLA reference dot.
    assert jnp.allclose(out, ref, atol=2e-3, rtol=2e-3), "mismatch vs reference"

    # Also exercise the multi-tile streaming path (grid > 1, Buffered(3),
    # partial tail block) at a still-small size.
    batch2 = 520
    x2 = jax.random.normal(kx2, (batch2, n_features), dtype=jnp.float32)
    out2 = jax.block_until_ready(
        logistic_regression(x2, weight, bias, batch_tile=128))
    ref2 = jax.nn.sigmoid(x2 @ weight.T + bias)
    assert out2.shape == (batch2, 1)
    assert jnp.allclose(out2, ref2, atol=2e-3, rtol=2e-3), "tiled mismatch"

    print("KERNEL_OK")
</pallas_src>

<mosaic_0001>
module attributes {stable_mosaic.version = 11 : i64} {
  func.func @logreg_kernel(%arg0: i32, %arg1: memref<8x32xf32, #tpu.memory_space<vmem>>, %arg2: memref<1x32xf32, #tpu.memory_space<vmem>>, %arg3: memref<1xf32, #tpu.memory_space<smem>>, %arg4: memref<1x8xf32, #tpu.memory_space<vmem>>) attributes {dimension_semantics = [#tpu.dimension_semantics<parallel>], iteration_bounds = array<i64: 1>, scalar_prefetch = 0 : i64, scratch_operands = 0 : i64, tpu.core_type = #tpu.core_type<tc>, window_params = [{transform_indices = @transform_0, window_bounds = array<i64: 8, 32>}, {pipeline_mode = #tpu.pipeline_mode<synchronous>, transform_indices = @transform_1, window_bounds = array<i64: 1, 32>}, {transform_indices = @transform_2, window_bounds = array<i64: 1>}, {transform_indices = @transform_3, window_bounds = array<i64: 1, 8>}]} {
    %c0 = arith.constant 0 : index
    %c0_0 = arith.constant 0 : index
    %0 = vector.load %arg2[%c0, %c0_0] : memref<1x32xf32, #tpu.memory_space<vmem>>, vector<1x32xf32>
    %c0_1 = arith.constant 0 : index
    %c0_2 = arith.constant 0 : index
    %1 = vector.load %arg1[%c0_1, %c0_2] : memref<8x32xf32, #tpu.memory_space<vmem>>, vector<8x32xf32>
    %cst = arith.constant dense<0.000000e+00> : vector<1x8xf32>
    %2 = tpu.matmul %0, %1, %cst {dimension_numbers = #tpu.dot_dimension_numbers<[1], [1], [0], [0], [0, 0, 1, 0], [], []>} : vector<1x32xf32>, vector<8x32xf32>, vector<1x8xf32> -> vector<1x8xf32>
    %c0_3 = arith.constant 0 : index
    %3 = memref.load %arg3[%c0_3] : memref<1xf32, #tpu.memory_space<smem>>
    %4 = vector.broadcast %3 : f32 to vector<1x8xf32>
    %5 = arith.addf %2, %4 : vector<1x8xf32>
    %cst_4 = arith.constant 0.000000e+00 : f32
    %6 = vector.broadcast %cst_4 : f32 to vector<1x8xf32>
    %7 = arith.subf %6, %5 : vector<1x8xf32>
    %8 = math.exp %7 : vector<1x8xf32>
    %cst_5 = arith.constant 1.000000e+00 : f32
    %9 = vector.broadcast %cst_5 : f32 to vector<1x8xf32>
    %10 = arith.addf %9, %8 : vector<1x8xf32>
    %cst_6 = arith.constant 1.000000e+00 : f32
    %11 = vector.broadcast %cst_6 : f32 to vector<1x8xf32>
    %12 = arith.divf %11, %10 : vector<1x8xf32>
    %c0_7 = arith.constant 0 : index
    %c0_8 = arith.constant 0 : index
    %13 = vector.load %arg4[%c0_7, %c0_8] : memref<1x8xf32, #tpu.memory_space<vmem>>, vector<1x8xf32>
    tpu.vector_store %arg4[%c0_7, %c0_8], %12 {strides = array<i32>} : memref<1x8xf32, #tpu.memory_space<vmem>>, vector<1x8xf32>,
    return
  }
  func.func @transform_0(%arg0: i32) -> (i32, i32) {
    %c0_i32 = arith.constant 0 : i32
    %c0_i32_0 = arith.constant 0 : i32
    return %arg0, %c0_i32 : i32, i32
  }
  func.func @transform_1(%arg0: i32) -> (i32, i32) {
    %c0_i32 = arith.constant 0 : i32
    %c0_i32_0 = arith.constant 0 : i32
    %c0_i32_1 = arith.constant 0 : i32
    return %c0_i32, %c0_i32_0 : i32, i32
  }
  func.func @transform_2(%arg0: i32) -> i32 {
    %c0_i32 = arith.constant 0 : i32
    %c0_i32_0 = arith.constant 0 : i32
    return %c0_i32 : i32
  }
  func.func @transform_3(%arg0: i32) -> (i32, i32) {
    %c0_i32 = arith.constant 0 : i32
    %c0_i32_0 = arith.constant 0 : i32
    return %c0_i32, %arg0 : i32, i32
  }
}

</mosaic_0001>

<bundles_post_ra>
// kernel: tpu_custom_call.1
= control target key start
LH: loop header
LB: loop body
LE: loop exit
PB: predicated region body
PF: predicated region fallthrough
CT: control target
= control target key end

     0   :  { %9 = vsyncpa [#allocation4], 0  ;;  %s193_s0 = inlined_call_operand.hbm [shape: f32[8,32], index: 0, kind: input, shape index: {}]   ;;  %s194_s1 = inlined_call_operand.vmem [shape: f32[1,32], index: 1, kind: input, shape index: {}]   ;;  %s195_s2 = inlined_call_operand.<no memory space> [shape: f32[1], index: 2, kind: input, shape index: {}]   ;;  %s196_s3 = inlined_call_operand.hbm [shape: f32[1,8], index: 3, kind: output, shape index: {}]  }
   0x1   :  { %10 = vsyncpa [#allocation5], 0  ;;  %s16_s14 = sshll.u32 %s193_s0, 4  ;;  %s159_s15 = smov [#allocation3]   ;;  %s17_s14 = int_to_ptr.hbm [resolvable:$true] %s16_s14 }
   0x2   :  { %s18_s16 = sshll.u32 %s159_s15, 4  ;;  %s19_s16 = int_to_ptr.vmem [resolvable:$true] %s18_s16 }
   0x3   :  { %21 = dma.hbm_to_vmem [thread:$0]  %s17_s14, 128, %s19_s16, [#allocation4]  }
   0x4   :  { %155 = dma.done.wait [#allocation4], 128  }
   0x5   :  { %156 = vsyncadd [#allocation4], 4294967168  ;;  %vm34_vm0 = vcmask 261120   ;;  %v31_v0 = vld [vmem:[#allocation3] sm:$0xff]  ;;  %v33_v2 = vstv %s195_s2  ;;  %s160_s0 = smov [#allocation6]   ;;  %s89_s2 = sshll.u32 %s196_s3, 4  ;;  %s90_s2 = int_to_ptr.hbm [resolvable:$true] %s89_s2 }
   0x6   :  { %99 = vmatpush.xpose.msk.msra.mxu0 %vm34_vm0, %v31_v0  ;;  %v30_v1 = vld [vmem:[%s194_s1] sm:$0x1]  ;;  %s87_s1 = sshll.u32 %s160_s0, 4  ;;  %vm80_vm4 = vcmask 57344   ;;  %s88_s1 = int_to_ptr.vmem [resolvable:$true] %s87_s1 }
   0x9   :  { %100 = vmatmul.msk.f32.vlgmr.msra.gmra.mxu0 %vm34_vm0, %v30_v1 }
  0x86   :  { %v58_v3 = vpop.f32.mrf.mxu0 }
  0x87   :  { %v59_v4 = vadd.f32 %v58_v3, %v33_v2 }
  0x89   :  { %v61_v5 = vsub.f32 0.0, %v59_v4 }
  0x8b   :  { %v62_v6 = vmul.f32 1.442695, %v61_v5 }
  0x8d   :  { %103 = vpow2.f32 %v62_v6 }
  0x93   :  { %v104_v7 = vpop.eup %103 }
  0x94   :  { %v64_v8 = vadd.f32 1.0, %v104_v7 }
  0x96   :  { %105 = vrcp.f32 %v64_v8  ;;  %v76_v12 = vand.u32 2147483648, %v64_v8  ;;  %v74_v14 = vand.u32 2147483647, %v64_v8  ;;  %vm70_vm2 = vweird.f32 %v64_v8 }
  0x98   :  { %v77_v16 = vor.u32 1.1754944e-38, %v76_v12  ;;  %vm75_vm5 = vcmp.eq.f32.partialorder %v74_v14, 8.507059e+37 }
  0x9c   :  { %v106_v9 = vpop.eup %105 }
  0x9d   :  { %v66_v10 = vmul.f32 %v106_v9, %v64_v8  ;;  %vm71_vm1 = vweird.f32 %v106_v9 }
  0x9e   :  { %vm72_vm3 = vmor %vm70_vm2, %vm71_vm1 }
  0x9f   :  { %v67_v11 = vsub.f32 1.0, %v66_v10 }
  0xa1   :  { %v68_v13 = vmul.f32 %v106_v9, %v67_v11 }
  0xa3   :  { %v69_v15 = vadd.f32 %v106_v9, %v68_v13 }
  0xa5   :  { %v73_v17 = vsel %vm72_vm3, %v106_v9, %v69_v15 }
  0xa6   :  { %v78_v18 = vsel %vm75_vm5, %v77_v16, %v73_v17 }
  0xa7   :  { %81 = vst.msk [vmem:[#allocation6] sm:$0x1] %vm80_vm4, %v78_v18 }
  0xa8   :  { %92 = dma.vmem_to_hbm [thread:$0]  %s88_s1, 16, %s90_s2, [#allocation5]  }
  0xa9   :  { %157 = dma.done.wait [#allocation5], 16  }
  0xaa   :  { %158 = vsyncadd [#allocation5], 4294967280 }
  0xab   :  { %97 = vsyncpa [#allocation4], 1 }
  0xac   :  { %98 = vsyncpa [#allocation5], 1 }

</bundles_post_ra>
